<compile_context>
chip_gen: v5e
topology: v5e:2x2
jax: 0.10.0
libtpu: 0.0.40
codegen_flags: <defaults>
</compile_context>

<pallas_src>
import jax
import jax.numpy as jnp
from jax.experimental import pallas as pl
from jax.experimental.pallas import tpu as pltpu


def _make_dma_copy_kernel(chunk_bounds):
    """Build a kernel that copies src -> dst via a few overlapped DMA chunks.

    `chunk_bounds` is a static tuple of (row_start, row_size) pairs; the
    chunks partition the leading axis of the flattened (rows, cols) slab.
    """

    def kernel(x_ref, o_ref, sem):
        # Issue all chunk DMAs back-to-back (overlapped), then wait on all.
        copies = []
        for ci, (start, size) in enumerate(chunk_bounds):
            cp = pltpu.make_async_copy(
                x_ref.at[pl.ds(start, size), :],
                o_ref.at[pl.ds(start, size), :],
                sem.at[ci],
            )
            cp.start()
            copies.append(cp)
        for cp in copies:
            cp.wait()

    return kernel


def _pallas_identity_copy(x4):
    """Materialize a fresh copy of an NCHW tensor via direct HBM->HBM DMA."""
    N, C, H, W = x4.shape
    rows = N * C * H
    cols = W
    itemsize = jnp.dtype(x4.dtype).itemsize
    total_bytes = rows * cols * itemsize

    # 2-4 contiguous chunks give DMA-issue overlap; clamp by row count.
    n_chunks = max(1, min(4, rows))
    base, rem = divmod(rows, n_chunks)
    chunk_bounds = []
    start = 0
    for ci in range(n_chunks):
        size = base + (1 if ci < rem else 0)
        if size == 0:
            continue
        chunk_bounds.append((start, size))
        start += size
    n_chunks = len(chunk_bounds)

    # Metadata-only reshape of the contiguous tensor into a 2-D slab whose
    # leading axis we chunk (each chunk is a contiguous byte range).
    flat = jnp.reshape(x4, (rows, cols))

    out = pl.pallas_call(
        _make_dma_copy_kernel(tuple(chunk_bounds)),
        out_shape=jax.ShapeDtypeStruct((rows, cols), x4.dtype),
        in_specs=[pl.BlockSpec(memory_space=pl.ANY)],
        out_specs=pl.BlockSpec(memory_space=pl.ANY),
        scratch_shapes=[pltpu.SemaphoreType.DMA((n_chunks,))],
        cost_estimate=pl.CostEstimate(
            flops=0, transcendentals=0, bytes_accessed=2 * total_bytes
        ),
    )(flat)
    return jnp.reshape(out, (N, C, H, W))


def unsqueeze(x, materialize=False):
    """JAX/Pallas equivalent of UnSqueeze.forward.

    3-D (N, H, W)    -> (N, 1, H, W)
    4-D (N, C, H, W) -> unchanged (identity, no copy)

    By default this is metadata-only (matching PyTorch's aliasing behavior).
    Pass materialize=True to produce a fresh buffer via the Pallas DMA-copy
    kernel (direct HBM->HBM, no VMEM staging).
    """
    if x.ndim == 4:
        x4 = x  # null-op: no HBM traffic
    elif x.ndim == 3:
        x4 = jnp.reshape(x, (x.shape[0], 1, x.shape[1], x.shape[2]))
    else:
        raise ValueError(f"UnSqueeze expects a 3-D or 4-D tensor, got ndim={x.ndim}")
    if not materialize:
        return x4
    return _pallas_identity_copy(x4)


if __name__ == "__main__":
    key = jax.random.PRNGKey(0)
    k3, k4 = jax.random.split(key)

    # 3-D case: (N, H, W) -> (N, 1, H, W) — metadata-only fast path.
    x3 = jax.random.normal(k3, (2, 16, 16), dtype=jnp.float32)
    y3 = jax.block_until_ready(unsqueeze(x3))
    assert y3.shape == (2, 1, 16, 16), y3.shape
    assert jnp.array_equal(y3[:, 0], x3)

    # 3-D case through the Pallas DMA copy (fresh buffer).
    y3m = jax.block_until_ready(unsqueeze(x3, materialize=True))
    assert y3m.shape == (2, 1, 16, 16), y3m.shape
    assert jnp.array_equal(y3m[:, 0], x3)

    # 4-D case: identity / null-op — no copy, no kernel.
    x4 = jax.random.normal(k4, (2, 4, 16, 16), dtype=jnp.float32)
    y4 = jax.block_until_ready(unsqueeze(x4))
    assert y4.shape == (2, 4, 16, 16), y4.shape
    assert jnp.array_equal(y4, x4)

    # 4-D case with an explicit fresh-buffer request (exercises the kernel).
    y4m = jax.block_until_ready(unsqueeze(x4, materialize=True))
    assert y4m.shape == (2, 4, 16, 16), y4m.shape
    assert jnp.array_equal(y4m, x4)

    # Also exercise a non-f32 dtype (DMA path has no layout constraints).
    x4b = jax.random.normal(k4, (2, 4, 16, 16), dtype=jnp.bfloat16)
    y4b = jax.block_until_ready(unsqueeze(x4b, materialize=True))
    assert y4b.shape == (2, 4, 16, 16), y4b.shape
    assert jnp.array_equal(y4b, x4b)

    print("KERNEL_OK")
</pallas_src>

<mosaic_0001>
module attributes {stable_mosaic.version = 11 : i64} {
  func.func @kernel(%arg0: memref<32x16xf32, #tpu.memory_space<any>>, %arg1: memref<32x16xf32, #tpu.memory_space<any>>, %arg2: memref<4x!tpu.dma_semaphore, #tpu.memory_space<semaphore_mem>>) attributes {dimension_semantics = [], scalar_prefetch = 0 : i64, scratch_operands = 1 : i64, tpu.core_type = #tpu.core_type<tc>} {
    %c0_i32 = arith.constant 0 : i32
    %c0_i32_0 = arith.constant 0 : i32
    %c0_i32_1 = arith.constant 0 : i32
    %0 = tpu.memref_slice %arg0[%c0_i32_0, %c0_i32_1] : memref<32x16xf32, #tpu.memory_space<any>> -> memref<8x16xf32, #tpu.memory_space<any>>
    %c0_i32_2 = arith.constant 0 : i32
    %c0_i32_3 = arith.constant 0 : i32
    %1 = tpu.memref_slice %arg1[%c0_i32_2, %c0_i32_3] : memref<32x16xf32, #tpu.memory_space<any>> -> memref<8x16xf32, #tpu.memory_space<any>>
    %2 = tpu.memref_slice %arg2[%c0_i32] : memref<4x!tpu.dma_semaphore, #tpu.memory_space<semaphore_mem>> -> memref<1x!tpu.dma_semaphore, #tpu.memory_space<semaphore_mem>>
    %3 = tpu.memref_squeeze %2 : memref<1x!tpu.dma_semaphore, #tpu.memory_space<semaphore_mem>> -> memref<!tpu.dma_semaphore, #tpu.memory_space<semaphore_mem>>
    tpu.enqueue_dma source(%0 : memref<8x16xf32, #tpu.memory_space<any>>) target(%1 : memref<8x16xf32, #tpu.memory_space<any>>) target_semaphore(%3 : memref<!tpu.dma_semaphore, #tpu.memory_space<semaphore_mem>>)
    %c1_i32 = arith.constant 1 : i32
    %c8_i32 = arith.constant 8 : i32
    %c0_i32_4 = arith.constant 0 : i32
    %4 = tpu.memref_slice %arg0[%c8_i32, %c0_i32_4] : memref<32x16xf32, #tpu.memory_space<any>> -> memref<8x16xf32, #tpu.memory_space<any>>
    %c8_i32_5 = arith.constant 8 : i32
    %c0_i32_6 = arith.constant 0 : i32
    %5 = tpu.memref_slice %arg1[%c8_i32_5, %c0_i32_6] : memref<32x16xf32, #tpu.memory_space<any>> -> memref<8x16xf32, #tpu.memory_space<any>>
    %6 = tpu.memref_slice %arg2[%c1_i32] : memref<4x!tpu.dma_semaphore, #tpu.memory_space<semaphore_mem>> -> memref<1x!tpu.dma_semaphore, #tpu.memory_space<semaphore_mem>>
    %7 = tpu.memref_squeeze %6 : memref<1x!tpu.dma_semaphore, #tpu.memory_space<semaphore_mem>> -> memref<!tpu.dma_semaphore, #tpu.memory_space<semaphore_mem>>
    tpu.enqueue_dma source(%4 : memref<8x16xf32, #tpu.memory_space<any>>) target(%5 : memref<8x16xf32, #tpu.memory_space<any>>) target_semaphore(%7 : memref<!tpu.dma_semaphore, #tpu.memory_space<semaphore_mem>>)
    %c2_i32 = arith.constant 2 : i32
    %c16_i32 = arith.constant 16 : i32
    %c0_i32_7 = arith.constant 0 : i32
    %8 = tpu.memref_slice %arg0[%c16_i32, %c0_i32_7] : memref<32x16xf32, #tpu.memory_space<any>> -> memref<8x16xf32, #tpu.memory_space<any>>
    %c16_i32_8 = arith.constant 16 : i32
    %c0_i32_9 = arith.constant 0 : i32
    %9 = tpu.memref_slice %arg1[%c16_i32_8, %c0_i32_9] : memref<32x16xf32, #tpu.memory_space<any>> -> memref<8x16xf32, #tpu.memory_space<any>>
    %10 = tpu.memref_slice %arg2[%c2_i32] : memref<4x!tpu.dma_semaphore, #tpu.memory_space<semaphore_mem>> -> memref<1x!tpu.dma_semaphore, #tpu.memory_space<semaphore_mem>>
    %11 = tpu.memref_squeeze %10 : memref<1x!tpu.dma_semaphore, #tpu.memory_space<semaphore_mem>> -> memref<!tpu.dma_semaphore, #tpu.memory_space<semaphore_mem>>
    tpu.enqueue_dma source(%8 : memref<8x16xf32, #tpu.memory_space<any>>) target(%9 : memref<8x16xf32, #tpu.memory_space<any>>) target_semaphore(%11 : memref<!tpu.dma_semaphore, #tpu.memory_space<semaphore_mem>>)
    %c3_i32 = arith.constant 3 : i32
    %c24_i32 = arith.constant 24 : i32
    %c0_i32_10 = arith.constant 0 : i32
    %12 = tpu.memref_slice %arg0[%c24_i32, %c0_i32_10] : memref<32x16xf32, #tpu.memory_space<any>> -> memref<8x16xf32, #tpu.memory_space<any>>
    %c24_i32_11 = arith.constant 24 : i32
    %c0_i32_12 = arith.constant 0 : i32
    %13 = tpu.memref_slice %arg1[%c24_i32_11, %c0_i32_12] : memref<32x16xf32, #tpu.memory_space<any>> -> memref<8x16xf32, #tpu.memory_space<any>>
    %14 = tpu.memref_slice %arg2[%c3_i32] : memref<4x!tpu.dma_semaphore, #tpu.memory_space<semaphore_mem>> -> memref<1x!tpu.dma_semaphore, #tpu.memory_space<semaphore_mem>>
    %15 = tpu.memref_squeeze %14 : memref<1x!tpu.dma_semaphore, #tpu.memory_space<semaphore_mem>> -> memref<!tpu.dma_semaphore, #tpu.memory_space<semaphore_mem>>
    tpu.enqueue_dma source(%12 : memref<8x16xf32, #tpu.memory_space<any>>) target(%13 : memref<8x16xf32, #tpu.memory_space<any>>) target_semaphore(%15 : memref<!tpu.dma_semaphore, #tpu.memory_space<semaphore_mem>>)
    %c0_i32_13 = arith.constant 0 : i32
    %c0_i32_14 = arith.constant 0 : i32
    %c0_i32_15 = arith.constant 0 : i32
    %16 = tpu.memref_slice %arg0[%c0_i32_14, %c0_i32_15] : memref<32x16xf32, #tpu.memory_space<any>> -> memref<8x16xf32, #tpu.memory_space<any>>
    %c0_i32_16 = arith.constant 0 : i32
    %c0_i32_17 = arith.constant 0 : i32
    %17 = tpu.memref_slice %arg1[%c0_i32_16, %c0_i32_17] : memref<32x16xf32, #tpu.memory_space<any>> -> memref<8x16xf32, #tpu.memory_space<any>>
    %18 = tpu.memref_slice %arg2[%c0_i32_13] : memref<4x!tpu.dma_semaphore, #tpu.memory_space<semaphore_mem>> -> memref<1x!tpu.dma_semaphore, #tpu.memory_space<semaphore_mem>>
    %19 = tpu.memref_squeeze %18 : memref<1x!tpu.dma_semaphore, #tpu.memory_space<semaphore_mem>> -> memref<!tpu.dma_semaphore, #tpu.memory_space<semaphore_mem>>
    tpu.wait_dma2 semaphore(%19 : memref<!tpu.dma_semaphore, #tpu.memory_space<semaphore_mem>>) src(%16 : memref<8x16xf32, #tpu.memory_space<any>>) dst(%17 : memref<8x16xf32, #tpu.memory_space<any>>)
    %c1_i32_18 = arith.constant 1 : i32
    %c8_i32_19 = arith.constant 8 : i32
    %c0_i32_20 = arith.constant 0 : i32
    %20 = tpu.memref_slice %arg0[%c8_i32_19, %c0_i32_20] : memref<32x16xf32, #tpu.memory_space<any>> -> memref<8x16xf32, #tpu.memory_space<any>>
    %c8_i32_21 = arith.constant 8 : i32
    %c0_i32_22 = arith.constant 0 : i32
    %21 = tpu.memref_slice %arg1[%c8_i32_21, %c0_i32_22] : memref<32x16xf32, #tpu.memory_space<any>> -> memref<8x16xf32, #tpu.memory_space<any>>
    %22 = tpu.memref_slice %arg2[%c1_i32_18] : memref<4x!tpu.dma_semaphore, #tpu.memory_space<semaphore_mem>> -> memref<1x!tpu.dma_semaphore, #tpu.memory_space<semaphore_mem>>
    %23 = tpu.memref_squeeze %22 : memref<1x!tpu.dma_semaphore, #tpu.memory_space<semaphore_mem>> -> memref<!tpu.dma_semaphore, #tpu.memory_space<semaphore_mem>>
    tpu.wait_dma2 semaphore(%23 : memref<!tpu.dma_semaphore, #tpu.memory_space<semaphore_mem>>) src(%20 : memref<8x16xf32, #tpu.memory_space<any>>) dst(%21 : memref<8x16xf32, #tpu.memory_space<any>>)
    %c2_i32_23 = arith.constant 2 : i32
    %c16_i32_24 = arith.constant 16 : i32
    %c0_i32_25 = arith.constant 0 : i32
    %24 = tpu.memref_slice %arg0[%c16_i32_24, %c0_i32_25] : memref<32x16xf32, #tpu.memory_space<any>> -> memref<8x16xf32, #tpu.memory_space<any>>
    %c16_i32_26 = arith.constant 16 : i32
    %c0_i32_27 = arith.constant 0 : i32
    %25 = tpu.memref_slice %arg1[%c16_i32_26, %c0_i32_27] : memref<32x16xf32, #tpu.memory_space<any>> -> memref<8x16xf32, #tpu.memory_space<any>>
    %26 = tpu.memref_slice %arg2[%c2_i32_23] : memref<4x!tpu.dma_semaphore, #tpu.memory_space<semaphore_mem>> -> memref<1x!tpu.dma_semaphore, #tpu.memory_space<semaphore_mem>>
    %27 = tpu.memref_squeeze %26 : memref<1x!tpu.dma_semaphore, #tpu.memory_space<semaphore_mem>> -> memref<!tpu.dma_semaphore, #tpu.memory_space<semaphore_mem>>
    tpu.wait_dma2 semaphore(%27 : memref<!tpu.dma_semaphore, #tpu.memory_space<semaphore_mem>>) src(%24 : memref<8x16xf32, #tpu.memory_space<any>>) dst(%25 : memref<8x16xf32, #tpu.memory_space<any>>)
    %c3_i32_28 = arith.constant 3 : i32
    %c24_i32_29 = arith.constant 24 : i32
    %c0_i32_30 = arith.constant 0 : i32
    %28 = tpu.memref_slice %arg0[%c24_i32_29, %c0_i32_30] : memref<32x16xf32, #tpu.memory_space<any>> -> memref<8x16xf32, #tpu.memory_space<any>>
    %c24_i32_31 = arith.constant 24 : i32
    %c0_i32_32 = arith.constant 0 : i32
    %29 = tpu.memref_slice %arg1[%c24_i32_31, %c0_i32_32] : memref<32x16xf32, #tpu.memory_space<any>> -> memref<8x16xf32, #tpu.memory_space<any>>
    %30 = tpu.memref_slice %arg2[%c3_i32_28] : memref<4x!tpu.dma_semaphore, #tpu.memory_space<semaphore_mem>> -> memref<1x!tpu.dma_semaphore, #tpu.memory_space<semaphore_mem>>
    %31 = tpu.memref_squeeze %30 : memref<1x!tpu.dma_semaphore, #tpu.memory_space<semaphore_mem>> -> memref<!tpu.dma_semaphore, #tpu.memory_space<semaphore_mem>>
    tpu.wait_dma2 semaphore(%31 : memref<!tpu.dma_semaphore, #tpu.memory_space<semaphore_mem>>) src(%28 : memref<8x16xf32, #tpu.memory_space<any>>) dst(%29 : memref<8x16xf32, #tpu.memory_space<any>>)
    return
  }
}

</mosaic_0001>

<bundles_post_ra>
// kernel: tpu_custom_call.1
= control target key start
LH: loop header
LB: loop body
LE: loop exit
PB: predicated region body
PF: predicated region fallthrough
CT: control target
= control target key end

     0   :  { %s255_s0 = inlined_call_operand.vmem [shape: f32[32,16], index: 0, kind: input, shape index: {}]   ;;  %s256_s1 = inlined_call_operand.vmem [shape: f32[32,16], index: 1, kind: output, shape index: {}]  }
   0x1   :  { %v32_v0 = vld [vmem:[%s255_s0] sm:$0xff] }
   0x2   :  { %33 = vst [vmem:[%s256_s1] sm:$0xff] %v32_v0 }
   0x3   :  { %39 = vsyncadd [#allocation2], 128  ;;  %v203_v1 = vld [vmem:[%s255_s0 + $0x8] sm:$0xff] }
   0x4   :  { %204 = vst [vmem:[%s256_s1 + $0x8] sm:$0xff] %v203_v1 }
   0x5   :  { %76 = vsyncadd [#allocation2 + $0x1], 128  ;;  %v205_v2 = vld [vmem:[%s255_s0 + $0x10] sm:$0xff] }
   0x6   :  { %206 = vst [vmem:[%s256_s1 + $0x10] sm:$0xff] %v205_v2 }
   0x7   :  { %113 = vsyncadd [#allocation2 + $0x2], 128  ;;  %v207_v3 = vld [vmem:[%s255_s0 + $0x18] sm:$0xff] }
   0x8   :  { %208 = vst [vmem:[%s256_s1 + $0x18] sm:$0xff] %v207_v3 }
   0x9   :  { %150 = vsyncadd [#allocation2 + $0x3], 128 }
   0xa   :  { %213 = dma.done.wait [#allocation2], 128 }
   0xb   :  { %214 = vsyncadd [#allocation2], 4294967168 }
   0xc   :  { %215 = dma.done.wait [#allocation2 + $0x1], 128 }
   0xd   :  { %216 = vsyncadd [#allocation2 + $0x1], 4294967168 }
   0xe   :  { %217 = dma.done.wait [#allocation2 + $0x2], 128 }
   0xf   :  { %218 = vsyncadd [#allocation2 + $0x2], 4294967168 }
  0x10   :  { %219 = dma.done.wait [#allocation2 + $0x3], 128 }
  0x11   :  { %220 = vsyncadd [#allocation2 + $0x3], 4294967168 }
  0x12   :  { %160 = vsyncmov [#allocation2] }
  0x15   :  { %s161_s22 = vpop.sfrf %160 }
  0x16   :  { %p209_p0 = scmp.ne.s32.totalorder %s161_s22, 0 }
  0x18   :  { %165 = shalt.err (%p209_p0)  }
  0x19   :  { %167 = vsyncmov [#allocation2 + $0x1] }
  0x1c   :  { %s168_s23 = vpop.sfrf %167 }
  0x1d   :  { %p210_p1 = scmp.ne.s32.totalorder %s168_s23, 0 }
  0x1f   :  { %172 = shalt.err (%p210_p1)  }
  0x20   :  { %174 = vsyncmov [#allocation2 + $0x2] }
  0x23   :  { %s175_s0 = vpop.sfrf %174 }
  0x24   :  { %p211_p2 = scmp.ne.s32.totalorder %s175_s0, 0 }
  0x26   :  { %179 = shalt.err (%p211_p2)  }
  0x27   :  { %181 = vsyncmov [#allocation2 + $0x3] }
  0x2a   :  { %s182_s1 = vpop.sfrf %181 }
  0x2b   :  { %p212_p3 = scmp.ne.s32.totalorder %s182_s1, 0 }
  0x2d   :  { %186 = shalt.err (%p212_p3)  }

</bundles_post_ra>
